<compile_context>
chip_gen: v6e
topology: v6e:2x2x1
jax: 0.10.0
libtpu: 0.0.40
codegen_flags: <defaults>
</compile_context>

<pallas_src>
import functools

import jax
import jax.numpy as jnp
import numpy as np
from jax import lax
from jax.experimental import pallas as pl
from jax.experimental.pallas import tpu as pltpu


def _causal_conv1d_kernel(x_ref, w2_ref, b_ref, o_ref, a_ref, *,
                          n, c_in, l, ksize, padding, l_out):
    # x_ref : (N, C_in, L)          raw (unpadded) input, full block
    # w2_ref: (C_out, K*C_in)       weight, columns ordered (k, c_in)
    # b_ref : (C_out, 1)            bias
    # o_ref : (C_out, LANES)        lane-dense output slab, column = b*L_out + t
    # a_ref : (K*C_in, LANES) VMEM  im2col scratch
    #
    # Zero fill covers both the implicit conv zero-padding and the lane tail.
    a_ref[...] = jnp.zeros_like(a_ref)

    # Build im2col once: A[k*C_in + c, b*L_out + t] = x[b, c, t + k - padding]
    # for the in-range taps (all slices are static).
    for b in range(n):
        xb = x_ref[b]                                   # (C_in, L)
        for kk in range(ksize):
            t0 = max(0, padding - kk)
            t1 = min(l_out, l + padding - kk)
            if t1 <= t0:
                continue
            s0 = t0 + kk - padding
            a_ref[kk * c_in:(kk + 1) * c_in,
                  b * l_out + t0:b * l_out + t1] = xb[:, s0:s0 + (t1 - t0)]

    # Single MXU matmul over the K*C_in contraction + bias epilogue.
    out = jnp.dot(w2_ref[...], a_ref[...], preferred_element_type=jnp.float32)
    o_ref[...] = (out + b_ref[...]).astype(o_ref.dtype)


def causal_conv1d(x, weight, bias, *, padding):
    """Equivalent of PyTorch nn.Conv1d(in_channels, out_channels, K, padding=padding).

    x:      (N, C_in, L)        float32
    weight: (C_out, C_in, K)    float32  (PyTorch layout)
    bias:   (C_out,)            float32
    returns (N, C_out, L + 2*padding - K + 1)
    """
    n, c_in, l = x.shape
    c_out, c_in_w, ksize = weight.shape
    assert c_in == c_in_w
    l_out = l + 2 * padding - ksize + 1
    # Lane-dense output slab: batch folded into lanes, rounded up to 128.
    lanes = max(128, ((n * l_out + 127) // 128) * 128)

    # W2[o, k*C_in + c] = weight[o, c, k]  -> matches im2col row ordering.
    w2 = jnp.transpose(weight, (0, 2, 1)).reshape(c_out, ksize * c_in)
    b2d = bias.reshape(c_out, 1)

    kernel = functools.partial(_causal_conv1d_kernel, n=n, c_in=c_in, l=l,
                               ksize=ksize, padding=padding, l_out=l_out)

    out_slab = pl.pallas_call(
        kernel,
        out_shape=jax.ShapeDtypeStruct((c_out, lanes), x.dtype),
        grid=(1,),
        in_specs=[
            pl.BlockSpec((n, c_in, l), lambda i: (0, 0, 0)),
            pl.BlockSpec((c_out, ksize * c_in), lambda i: (0, 0)),
            pl.BlockSpec((c_out, 1), lambda i: (0, 0)),
        ],
        out_specs=pl.BlockSpec((c_out, lanes), lambda i: (0, 0)),
        scratch_shapes=[pltpu.VMEM((ksize * c_in, lanes), jnp.float32)],
        compiler_params=pltpu.CompilerParams(
            dimension_semantics=("arbitrary",)),
    )(x, w2, b2d)

    # Strip lane padding and unfold batch (columns are ordered b*L_out + t).
    out = out_slab[:, :n * l_out].reshape(c_out, n, l_out)
    return jnp.transpose(out, (1, 0, 2))


def _reference_conv1d(x, weight, bias, padding):
    # lax reference (NCL / OIK layout, matches PyTorch nn.Conv1d).
    out = lax.conv_general_dilated(
        x, weight,
        window_strides=(1,),
        padding=[(padding, padding)],
        dimension_numbers=("NCH", "OIH", "NCH"),
    )
    return out + bias[None, :, None]


if __name__ == "__main__":
    # Module config (synthetic, deterministic init — not a checkpoint load).
    in_channels, out_channels = 4, 8
    kernel_size, padding = 3, 2           # causal-style: padding = kernel_size - 1
    batch, length = 2, 16

    key = jax.random.PRNGKey(0)
    kx, kw, kb = jax.random.split(key, 3)

    # PyTorch Conv1d default init: U(-bound, bound), bound = 1/sqrt(C_in * K).
    bound = 1.0 / np.sqrt(in_channels * kernel_size)
    x = jax.random.normal(kx, (batch, in_channels, length), dtype=jnp.float32)
    weight = jax.random.uniform(kw, (out_channels, in_channels, kernel_size),
                                minval=-bound, maxval=bound, dtype=jnp.float32)
    bias = jax.random.uniform(kb, (out_channels,),
                              minval=-bound, maxval=bound, dtype=jnp.float32)

    out = causal_conv1d(x, weight, bias, padding=padding)
    out = jax.block_until_ready(out)

    ref = _reference_conv1d(x, weight, bias, padding)
    np.testing.assert_allclose(np.asarray(out), np.asarray(ref),
                               rtol=1e-5, atol=1e-5)
    assert out.shape == (batch, out_channels, length + 2 * padding - kernel_size + 1)
    print("KERNEL_OK")
</pallas_src>

<mosaic_0001>
module attributes {stable_mosaic.version = 11 : i64} {
  func.func @_causal_conv1d_kernel(%arg0: i32, %arg1: memref<2x4x16xf32, #tpu.memory_space<vmem>>, %arg2: memref<8x12xf32, #tpu.memory_space<vmem>>, %arg3: memref<8x1xf32, #tpu.memory_space<vmem>>, %arg4: memref<8x128xf32, #tpu.memory_space<vmem>>, %arg5: memref<12x128xf32, #tpu.memory_space<vmem>>) attributes {dimension_semantics = [#tpu.dimension_semantics<arbitrary>], iteration_bounds = array<i64: 1>, scalar_prefetch = 0 : i64, scratch_operands = 1 : i64, tpu.core_type = #tpu.core_type<tc>, window_params = [{pipeline_mode = #tpu.pipeline_mode<synchronous>, transform_indices = @transform_0, window_bounds = array<i64: 2, 4, 16>}, {pipeline_mode = #tpu.pipeline_mode<synchronous>, transform_indices = @transform_1, window_bounds = array<i64: 8, 12>}, {pipeline_mode = #tpu.pipeline_mode<synchronous>, transform_indices = @transform_2, window_bounds = array<i64: 8, 1>}, {pipeline_mode = #tpu.pipeline_mode<synchronous>, transform_indices = @transform_3, window_bounds = array<i64: 8, 128>}]} {
    %cst = arith.constant 0.000000e+00 : f32
    %0 = vector.broadcast %cst : f32 to vector<12x128xf32>
    %c0 = arith.constant 0 : index
    %c0_0 = arith.constant 0 : index
    %1 = vector.load %arg5[%c0, %c0_0] : memref<12x128xf32, #tpu.memory_space<vmem>>, vector<12x128xf32>
    tpu.vector_store %arg5[%c0, %c0_0], %0 {strides = array<i32>} : memref<12x128xf32, #tpu.memory_space<vmem>>, vector<12x128xf32>,
    %c0_1 = arith.constant 0 : index
    %c0_2 = arith.constant 0 : index
    %c0_3 = arith.constant 0 : index
    %2 = vector.load %arg1[%c0_1, %c0_2, %c0_3] : memref<2x4x16xf32, #tpu.memory_space<vmem>>, vector<1x4x16xf32>
    %3 = vector.shape_cast %2 : vector<1x4x16xf32> to vector<4x16xf32>
    %c0_4 = arith.constant 0 : index
    %c2 = arith.constant 2 : index
    %4 = vector.load %arg5[%c0_4, %c2] : memref<12x128xf32, #tpu.memory_space<vmem>>, vector<4x16xf32>
    tpu.vector_store %arg5[%c0_4, %c2], %3 {strides = array<i32>} : memref<12x128xf32, #tpu.memory_space<vmem>>, vector<4x16xf32>,
    %c4 = arith.constant 4 : index
    %c1 = arith.constant 1 : index
    %5 = vector.load %arg5[%c4, %c1] : memref<12x128xf32, #tpu.memory_space<vmem>>, vector<4x16xf32>
    tpu.vector_store %arg5[%c4, %c1], %3 {strides = array<i32>} : memref<12x128xf32, #tpu.memory_space<vmem>>, vector<4x16xf32>,
    %c8 = arith.constant 8 : index
    %c0_5 = arith.constant 0 : index
    %6 = vector.load %arg5[%c8, %c0_5] : memref<12x128xf32, #tpu.memory_space<vmem>>, vector<4x16xf32>
    tpu.vector_store %arg5[%c8, %c0_5], %3 {strides = array<i32>} : memref<12x128xf32, #tpu.memory_space<vmem>>, vector<4x16xf32>,
    %c1_6 = arith.constant 1 : index
    %c0_7 = arith.constant 0 : index
    %c0_8 = arith.constant 0 : index
    %7 = vector.load %arg1[%c1_6, %c0_7, %c0_8] : memref<2x4x16xf32, #tpu.memory_space<vmem>>, vector<1x4x16xf32>
    %8 = vector.shape_cast %7 : vector<1x4x16xf32> to vector<4x16xf32>
    %c0_9 = arith.constant 0 : index
    %c20 = arith.constant 20 : index
    %9 = vector.load %arg5[%c0_9, %c20] : memref<12x128xf32, #tpu.memory_space<vmem>>, vector<4x16xf32>
    tpu.vector_store %arg5[%c0_9, %c20], %8 {strides = array<i32>} : memref<12x128xf32, #tpu.memory_space<vmem>>, vector<4x16xf32>,
    %c4_10 = arith.constant 4 : index
    %c19 = arith.constant 19 : index
    %10 = vector.load %arg5[%c4_10, %c19] : memref<12x128xf32, #tpu.memory_space<vmem>>, vector<4x16xf32>
    tpu.vector_store %arg5[%c4_10, %c19], %8 {strides = array<i32>} : memref<12x128xf32, #tpu.memory_space<vmem>>, vector<4x16xf32>,
    %c8_11 = arith.constant 8 : index
    %c18 = arith.constant 18 : index
    %11 = vector.load %arg5[%c8_11, %c18] : memref<12x128xf32, #tpu.memory_space<vmem>>, vector<4x16xf32>
    tpu.vector_store %arg5[%c8_11, %c18], %8 {strides = array<i32>} : memref<12x128xf32, #tpu.memory_space<vmem>>, vector<4x16xf32>,
    %c0_12 = arith.constant 0 : index
    %c0_13 = arith.constant 0 : index
    %12 = vector.load %arg2[%c0_12, %c0_13] : memref<8x12xf32, #tpu.memory_space<vmem>>, vector<8x12xf32>
    %c0_14 = arith.constant 0 : index
    %c0_15 = arith.constant 0 : index
    %13 = vector.load %arg5[%c0_14, %c0_15] : memref<12x128xf32, #tpu.memory_space<vmem>>, vector<12x128xf32>
    %cst_16 = arith.constant dense<0.000000e+00> : vector<8x128xf32>
    %14 = tpu.matmul %12, %13, %cst_16 {dimension_numbers = #tpu.dot_dimension_numbers<[1], [0], [0], [1], [0, 0, 1, 1], [], []>} : vector<8x12xf32>, vector<12x128xf32>, vector<8x128xf32> -> vector<8x128xf32>
    %c0_17 = arith.constant 0 : index
    %c0_18 = arith.constant 0 : index
    %15 = vector.load %arg3[%c0_17, %c0_18] : memref<8x1xf32, #tpu.memory_space<vmem>>, vector<8x1xf32>
    %16 = vector.broadcast %15 : vector<8x1xf32> to vector<8x128xf32>
    %17 = arith.addf %14, %16 : vector<8x128xf32>
    %c0_19 = arith.constant 0 : index
    %c0_20 = arith.constant 0 : index
    %18 = vector.load %arg4[%c0_19, %c0_20] : memref<8x128xf32, #tpu.memory_space<vmem>>, vector<8x128xf32>
    tpu.vector_store %arg4[%c0_19, %c0_20], %17 {strides = array<i32>} : memref<8x128xf32, #tpu.memory_space<vmem>>, vector<8x128xf32>,
    return
  }
  func.func @transform_0(%arg0: i32) -> (i32, i32, i32) {
    %c0_i32 = arith.constant 0 : i32
    %c0_i32_0 = arith.constant 0 : i32
    %c0_i32_1 = arith.constant 0 : i32
    %c0_i32_2 = arith.constant 0 : i32
    return %c0_i32, %c0_i32_0, %c0_i32_1 : i32, i32, i32
  }
  func.func @transform_1(%arg0: i32) -> (i32, i32) {
    %c0_i32 = arith.constant 0 : i32
    %c0_i32_0 = arith.constant 0 : i32
    %c0_i32_1 = arith.constant 0 : i32
    return %c0_i32, %c0_i32_0 : i32, i32
  }
  func.func @transform_2(%arg0: i32) -> (i32, i32) {
    %c0_i32 = arith.constant 0 : i32
    %c0_i32_0 = arith.constant 0 : i32
    %c0_i32_1 = arith.constant 0 : i32
    return %c0_i32, %c0_i32_0 : i32, i32
  }
  func.func @transform_3(%arg0: i32) -> (i32, i32) {
    %c0_i32 = arith.constant 0 : i32
    %c0_i32_0 = arith.constant 0 : i32
    %c0_i32_1 = arith.constant 0 : i32
    return %c0_i32, %c0_i32_0 : i32, i32
  }
}

</mosaic_0001>

<bundles_post_ra>
// kernel: tpu_custom_call.1
= control target key start
LH: loop header
LB: loop body
LE: loop exit
PB: predicated region body
PF: predicated region fallthrough
CT: control target
= control target key end

     0   :  { %8 = vsyncpa [#allocation4], 0  ;;  %s278_s0 = inlined_call_operand.vmem [shape: f32[2,4,16], index: 0, kind: input, shape index: {}]   ;;  %s279_s1 = inlined_call_operand.hbm [shape: f32[8,12], index: 1, kind: input, shape index: {}]   ;;  %s280_s2 = inlined_call_operand.vmem [shape: f32[8,1], index: 2, kind: input, shape index: {}]   ;;  %s281_s3 = inlined_call_operand.hbm [shape: f32[8,128], index: 3, kind: output, shape index: {}]  }
   0x1   :  { %9 = vsyncpa [#allocation5], 0  ;;  %s233_s12 = smov [#allocation3]  }
   0x2   :  { %s18_s13 = sshll.u32 %s233_s12, 4  ;;  %s19_s13 = int_to_ptr.vmem [resolvable:$true] %s18_s13 }
   0x3   :  { %s197_s14 = scalar_lea.vmem %s19_s13, 128  ;;  %p202_p1 = scmp.lt.s32.totalorder %s19_s13, %s19_s13 }
   0x4   :  { %p198_p0 = scmp.ne.s32.totalorder %s19_s13, %s197_s14  ;;  %p203_p2 = scmp.lt.s32.totalorder %s197_s14, %s197_s14 }
   0x6   :  { %p204_p3 = por %p203_p2, %p202_p1 }
   0x8   :  { %p205_p4 = pnand %p204_p3, %p198_p0 }
   0xa   :  { %208 = shalt.err (!%p205_p4)
}
   0xb   :  { %21 = dma.hbm_to_vmem [thread:$0]  %s279_s1, 128, %s19_s13, [#allocation4]  }
   0xc   :  { %229 = dma.done.wait [#allocation4], 128  }
   0xd   :  { %230 = vsyncadd [#allocation4], 4294967168  ;;  %v234_v0 = vmov 0.0   ;;  %vm41_vm0 = vcmask 125952   ;;  %v164_v1 = vld [vmem:[%s278_s0 + $0x4] sm:$0xf] }
   0xe   :  { %28 = vst [vmem:[#allocation2 + $0x8] sm:$0xf] %v234_v0  ;;  %27 = vst [vmem:[#allocation2] sm:$0xff] %v234_v0  ;;  %170 = vmatprep.subr.mxu0 %v234_v0  ;;  %v29_v2 = vld [vmem:[%s278_s0] sm:$0xf]  ;;  %s235_s21 = smov 18  }
   0xf   :  { %56 = vrot.lane.b32.xlu0 %v164_v1, %s235_s21  ;;  %s236_s22 = smov 1   ;;  %42 = vst.msk [vmem:[#allocation2 + $0x8] sm:$0xf] %vm41_vm0, %v29_v2  ;;  %vm237_vm1 = vmmov 0   ;;  %s238_s1 = smov 2   ;;  %v240_v3 = vmov 0  }
  0x10   :  { %36 = vrot.lane.b32.xlu1 %v29_v2, %s236_s22  ;;  %174 = vmatprep.mubr.msk.f32.mxu0 %vm237_vm1, %v234_v0  ;;  %s239_s23 = smov 20   ;;  %v64_v4 = vld [vmem:[%s280_s2] sm:$0xff]  ;;  %s241_s26 = smov 19   ;;  %vm59_vm2 = vcmask 273552   ;;  %vm39_vm3 = vcmask 134152   ;;  %vm34_vm4 = vcmask 142352  }
  0x11   :  { %187 = vset.pattern.permute.xlu1 %v240_v3  ;;  %188 = vset.pattern.permute.xlu0 %v240_v3  ;;  %vm49_vm5 = vcmask 289952   ;;  %vm54_vm6 = vcmask 281752   ;;  %vm74_vm7 = vcmask 1043456   ;;  %v61_v11 = vld [vmem:[#allocation3] sm:$0xff]  ;;  %vm70_vm8 = vcmask 97280   ;;  %s242_s0 = smov [#allocation6]  }
  0x12   :  { %s155_s2 = sshll.u32 %s242_s0, 4  ;;  %s156_s2 = int_to_ptr.vmem [resolvable:$true] %s155_s2 }
  0x13   :  { %31 = vrot.lane.b32.xlu0 %v29_v2, %s238_s1  ;;  %s209_s27 = scalar_lea.vmem %s156_s2, 128  ;;  %p214_p6 = scmp.lt.s32.totalorder %s156_s2, %s156_s2 }
  0x14   :  { %46 = vrot.lane.b32.xlu1 %v164_v1, %s239_s23  ;;  %p210_p5 = scmp.ne.s32.totalorder %s156_s2, %s209_s27  ;;  %p215_p7 = scmp.lt.s32.totalorder %s209_s27, %s209_s27 }
  0x16   :  { %p216_p8 = por %p215_p7, %p214_p6 }
  0x17   :  { %51 = vrot.lane.b32.xlu0 %v164_v1, %s241_s26 }
  0x18   :  { %67 = vperm.xlu1 %187, %v64_v4   ;;  %p217_p9 = pnand %p216_p8, %p210_p5 }
  0x81   :  { %v57_v5 = vpop.permute.xlu0 %56 }
  0x82   :  { %v37_v6 = vpop.permute.xlu1 %36  ;;  %60 = vst.msk [vmem:[#allocation2 + $0x8] sm:$0xf] %vm59_vm2, %v57_v5 }
  0x83   :  { %40 = vst.msk [vmem:[#allocation2 + $0x4] sm:$0xf] %vm39_vm3, %v37_v6 }
  0x85   :  { %v32_v7 = vpop.permute.xlu0 %31 }
  0x86   :  { %v47_v8 = vpop.permute.xlu1 %46  ;;  %35 = vst.msk [vmem:[#allocation2] sm:$0xf] %vm34_vm4, %v32_v7 }
  0x87   :  { %50 = vst.msk [vmem:[#allocation2] sm:$0xf] %vm49_vm5, %v47_v8 }
  0x89   :  { %v52_v9 = vpop.permute.xlu0 %51  ;;  %v63_v10 = vld [vmem:[#allocation2 + $0x8] sm:$0xf] }
  0x8a   :  { %55 = vst.msk [vmem:[#allocation2 + $0x4] sm:$0xf] %vm54_vm6, %v52_v9  ;;  %171 = vmatpush3.msk.msra.mxu0 %vm74_vm7, %v63_v10 }
  0x8b   :  { %172 = vmatprep.subr.mxu0 %v234_v0 }
  0x91   :  { %v62_v12 = vld [vmem:[#allocation2] sm:$0xff] }
  0x92   :  { %173 = vmatpush3.msra.mxu0 %v62_v12 }
  0x93   :  { %175 = vmatmul.mubr.msk.f32.vlgmr.msra.gmra.mxu0 %vm70_vm8, %v61_v11  ;;  %v68_v13 = vpop.permute.xlu1 %67 }
 0x153   :  { %v144_v14 = vpop.f32.mrf.mxu0 }
 0x154   :  { %v145_v15 = vadd.f32 %v144_v14, %v68_v13 }
 0x155   :  { %v176_v16 = vpop.f32.mrf.mxu0 }
 0x156   :  { %148 = vst [vmem:[#allocation6] sm:$0xff] %v145_v15 }
 0x157   :  { %220 = shalt.err (!%p217_p9)
}
 0x158   :  { %158 = dma.vmem_to_hbm [thread:$0]  %s156_s2, 128, %s281_s3, [#allocation5]  }
 0x159   :  { %231 = dma.done.wait [#allocation5], 128  }
 0x15a   :  { %232 = vsyncadd [#allocation5], 4294967168 }
 0x15b   :  { %162 = vsyncpa [#allocation4], 1 }
 0x15c   :  { %163 = vsyncpa [#allocation5], 1 }

</bundles_post_ra>
